<compile_context>
chip_gen: v6e
topology: v6e:2x2x1
jax: 0.10.0
libtpu: 0.0.40
codegen_flags: <defaults>
</compile_context>

<pallas_src>
import jax
import jax.numpy as jnp
from jax import lax
from jax.experimental import pallas as pl
from jax.experimental.pallas import tpu as pltpu

BN_EPS = 1e-5

# Lane-dense padded widths used by the kernel and the packed parameters.
K_PAD = 384    # 361 concat features (352 state + 9 action) -> 3 * 128 lanes
H1_PAD = 384   # fc1 output 300 -> 384
H2_PAD = 128   # fc2 output 100 -> 128

# Rows of the packed small-parameter table (single f32 [8, K_PAD] input).
ROW_GAMMA, ROW_BETA, ROW_B1, ROW_B2, ROW_W3, ROW_B3 = 0, 1, 2, 3, 4, 5


def critic_kernel(s_ref, a_ref, tbl_ref, w1_ref, w2_ref, o_ref, x_scr):
    # s_ref: [B, 352] f32, a_ref: [B, 9] f32, tbl_ref: [8, 384] f32,
    # w1_ref: [384, 384] bf16, w2_ref: [384, 128] bf16, o_ref: [B, 1] f32,
    # x_scr: [B, 384] f32 VMEM scratch (assembled padded concat).
    B, S = s_ref.shape
    A = a_ref.shape[1]

    # ---- assemble the zero-padded concat [B, K_PAD] in VMEM scratch ---------
    x_scr[...] = jnp.zeros_like(x_scr)
    x_scr[:, :S] = s_ref[...]
    x_scr[:, S:S + A] = a_ref[...]
    x = x_scr[...]                                        # [B, 384] f32

    # ---- BatchNorm1d(361), training mode: batch stats, biased variance ------
    # Pad lanes are all-zero -> diff = 0 there, and pad gamma/beta are 0, so
    # the BN output on pad lanes is exactly 0.
    gamma = tbl_ref[ROW_GAMMA:ROW_GAMMA + 1, :]           # [1, 384]
    beta = tbl_ref[ROW_BETA:ROW_BETA + 1, :]              # [1, 384]
    mean = jnp.mean(x, axis=0, keepdims=True)
    diff = x - mean
    var = jnp.mean(diff * diff, axis=0, keepdims=True)    # biased variance
    q = diff * lax.rsqrt(var + BN_EPS) * gamma + beta     # [B, 384] f32

    # ---- fc1 + relu: single bf16 MXU dispatch, K = 384 ----------------------
    h1 = jnp.dot(q.astype(jnp.bfloat16), w1_ref[...],
                 preferred_element_type=jnp.float32) + tbl_ref[ROW_B1:ROW_B1 + 1, :]
    h1 = jnp.maximum(h1, 0.0)                             # [B, 384] f32 (pad cols = 0)

    # ---- fc2 + relu ----------------------------------------------------------
    h2 = jnp.dot(h1.astype(jnp.bfloat16), w2_ref[...],
                 preferred_element_type=jnp.float32) + tbl_ref[ROW_B2:ROW_B2 + 1, :H2_PAD]
    h2 = jnp.maximum(h2, 0.0)                             # [B, 128] f32 (pad cols = 0)

    # ---- fc3: VPU multiply + XLU lane reduction (no N=1 MXU pass) -----------
    out = (jnp.sum(h2 * tbl_ref[ROW_W3:ROW_W3 + 1, :H2_PAD], axis=-1, keepdims=True)
           + tbl_ref[ROW_B3:ROW_B3 + 1, 0:1])
    o_ref[...] = out.astype(o_ref.dtype)                  # [B, 1]


def critic_forward(state, action, p):
    """state: [B, 352] f32, action: [B, 9] f32, p: packed kernel params."""
    B = state.shape[0]
    args = (state, action, p["tbl"], p["w1"], p["w2"])

    flops = 2 * B * (K_PAD * H1_PAD + H1_PAD * H2_PAD + H2_PAD) + 10 * B * K_PAD
    bytes_accessed = sum(int(x.size) * x.dtype.itemsize for x in args) + B * 4

    vmem = pl.BlockSpec(memory_space=pltpu.MemorySpace.VMEM)
    return pl.pallas_call(
        critic_kernel,
        out_shape=jax.ShapeDtypeStruct((B, 1), jnp.float32),
        in_specs=[vmem] * len(args),
        out_specs=vmem,
        scratch_shapes=[pltpu.VMEM((B, K_PAD), jnp.float32)],
        compiler_params=pltpu.CompilerParams(vmem_limit_bytes=2 * 1024 * 1024),
        cost_estimate=pl.CostEstimate(flops=flops,
                                      transcendentals=K_PAD,
                                      bytes_accessed=bytes_accessed),
    )(*args)


def pack_params(raw, state_dim, action_dim):
    """One-time (offline) conversion of canonical f32 params to kernel layout:
    one small f32 parameter table + two zero-padded, lane-dense bf16 weights."""
    in_dim = state_dim + action_dim                       # 361
    assert in_dim <= K_PAD

    tbl = jnp.zeros((8, K_PAD), jnp.float32)
    tbl = tbl.at[ROW_GAMMA, :in_dim].set(raw["gamma"][0])
    tbl = tbl.at[ROW_BETA, :in_dim].set(raw["beta"][0])
    tbl = tbl.at[ROW_B1, :300].set(raw["b1"][0])
    tbl = tbl.at[ROW_B2, :100].set(raw["b2"][0])
    tbl = tbl.at[ROW_W3, :100].set(raw["w3"][:, 0])
    tbl = tbl.at[ROW_B3, 0].set(raw["b3"][0, 0])

    w1 = (jnp.zeros((K_PAD, H1_PAD), jnp.float32)
          .at[:in_dim, :300].set(raw["w1"]).astype(jnp.bfloat16))   # [384, 384] bf16
    w2 = (jnp.zeros((H1_PAD, H2_PAD), jnp.float32)
          .at[:300, :100].set(raw["w2"]).astype(jnp.bfloat16))      # [384, 128] bf16
    return {"tbl": tbl, "w1": w1, "w2": w2}


def init_params(key, state_dim, action_dim):
    in_dim = state_dim + action_dim  # must equal 361 per BatchNorm1d(361)
    assert in_dim == 361
    ks = jax.random.split(key, 6)

    def linear(kw, kb, fan_in, fan_out):
        bound = 1.0 / jnp.sqrt(fan_in)
        w = jax.random.uniform(kw, (fan_in, fan_out), jnp.float32, -bound, bound)
        b = jax.random.uniform(kb, (1, fan_out), jnp.float32, -bound, bound)
        return w, b

    w1, b1 = linear(ks[0], ks[1], in_dim, 300)
    w2, b2 = linear(ks[2], ks[3], 300, 100)
    w3, b3 = linear(ks[4], ks[5], 100, 1)
    return {
        "gamma": jnp.ones((1, in_dim), jnp.float32),   # BatchNorm weight init
        "beta": jnp.zeros((1, in_dim), jnp.float32),   # BatchNorm bias init
        "w1": w1, "b1": b1,
        "w2": w2, "b2": b2,
        "w3": w3, "b3": b3,
    }


def critic_ref(state, action, raw):
    # Pure-JAX f32 reference for correctness checking (unpadded math).
    x = jnp.concatenate([state, action], axis=1)
    mean = jnp.mean(x, axis=0, keepdims=True)
    var = jnp.mean((x - mean) ** 2, axis=0, keepdims=True)
    q = (x - mean) / jnp.sqrt(var + BN_EPS) * raw["gamma"] + raw["beta"]
    q = jnp.maximum(q @ raw["w1"] + raw["b1"], 0.0)
    q = jnp.maximum(q @ raw["w2"] + raw["b2"], 0.0)
    return q @ raw["w3"] + raw["b3"]


if __name__ == "__main__":
    key = jax.random.PRNGKey(0)
    k_p, k_s, k_a = jax.random.split(key, 3)

    batch = 8
    state_dim, action_dim = 352, 9          # 352 + 9 = 361 (BatchNorm1d(361))

    raw = init_params(k_p, state_dim, action_dim)
    params = pack_params(raw, state_dim, action_dim)
    state = jax.random.normal(k_s, (batch, state_dim), jnp.float32)
    action = jax.random.normal(k_a, (batch, action_dim), jnp.float32)

    out = critic_forward(state, action, params)
    out = jax.block_until_ready(out)

    ref = critic_ref(state, action, raw)
    assert out.shape == (batch, 1)
    # bf16 matmul weights vs. f32 reference -> loosened tolerance (documented).
    assert jnp.allclose(out, ref, atol=5e-2, rtol=5e-2), \
        float(jnp.max(jnp.abs(out - ref)))

    print("KERNEL_OK")
</pallas_src>

<mosaic_0001>
module attributes {stable_mosaic.version = 11 : i64} {
  func.func @critic_kernel(%arg0: memref<8x352xf32, #tpu.memory_space<vmem>>, %arg1: memref<8x9xf32, #tpu.memory_space<vmem>>, %arg2: memref<8x384xf32, #tpu.memory_space<vmem>>, %arg3: memref<384x384xbf16, #tpu.memory_space<vmem>>, %arg4: memref<384x128xbf16, #tpu.memory_space<vmem>>, %arg5: memref<8x1xf32, #tpu.memory_space<vmem>>, %arg6: memref<8x384xf32, #tpu.memory_space<vmem>>) attributes {dimension_semantics = [], scalar_prefetch = 0 : i64, scratch_operands = 1 : i64, tpu.core_type = #tpu.core_type<tc>} {
    %cst = arith.constant 0.000000e+00 : f32
    %0 = vector.broadcast %cst : f32 to vector<8x384xf32>
    %c0 = arith.constant 0 : index
    %c0_0 = arith.constant 0 : index
    %1 = vector.load %arg6[%c0, %c0_0] : memref<8x384xf32, #tpu.memory_space<vmem>>, vector<8x384xf32>
    tpu.vector_store %arg6[%c0, %c0_0], %0 {strides = array<i32>} : memref<8x384xf32, #tpu.memory_space<vmem>>, vector<8x384xf32>,
    %c0_1 = arith.constant 0 : index
    %c0_2 = arith.constant 0 : index
    %2 = vector.load %arg0[%c0_1, %c0_2] : memref<8x352xf32, #tpu.memory_space<vmem>>, vector<8x352xf32>
    %c0_3 = arith.constant 0 : index
    %c0_4 = arith.constant 0 : index
    %3 = vector.load %arg6[%c0_3, %c0_4] : memref<8x384xf32, #tpu.memory_space<vmem>>, vector<8x352xf32>
    tpu.vector_store %arg6[%c0_3, %c0_4], %2 {strides = array<i32>} : memref<8x384xf32, #tpu.memory_space<vmem>>, vector<8x352xf32>,
    %c0_5 = arith.constant 0 : index
    %c0_6 = arith.constant 0 : index
    %4 = vector.load %arg1[%c0_5, %c0_6] : memref<8x9xf32, #tpu.memory_space<vmem>>, vector<8x9xf32>
    %c0_7 = arith.constant 0 : index
    %c352 = arith.constant 352 : index
    %5 = vector.load %arg6[%c0_7, %c352] : memref<8x384xf32, #tpu.memory_space<vmem>>, vector<8x9xf32>
    tpu.vector_store %arg6[%c0_7, %c352], %4 {strides = array<i32>} : memref<8x384xf32, #tpu.memory_space<vmem>>, vector<8x9xf32>,
    %c0_8 = arith.constant 0 : index
    %c0_9 = arith.constant 0 : index
    %6 = vector.load %arg6[%c0_8, %c0_9] : memref<8x384xf32, #tpu.memory_space<vmem>>, vector<8x384xf32>
    %c0_10 = arith.constant 0 : index
    %c0_11 = arith.constant 0 : index
    %7 = vector.load %arg2[%c0_10, %c0_11] : memref<8x384xf32, #tpu.memory_space<vmem>>, vector<1x384xf32>
    %c1 = arith.constant 1 : index
    %c0_12 = arith.constant 0 : index
    %8 = vector.load %arg2[%c1, %c0_12] : memref<8x384xf32, #tpu.memory_space<vmem>>, vector<1x384xf32>
    %cst_13 = arith.constant dense<0.000000e+00> : vector<384xf32>
    %9 = vector.multi_reduction <add>, %6, %cst_13 [0] : vector<8x384xf32> to vector<384xf32>
    %10 = vector.shape_cast %9 : vector<384xf32> to vector<1x384xf32>
    %cst_14 = arith.constant 8.000000e+00 : f32
    %11 = vector.broadcast %cst_14 : f32 to vector<1x384xf32>
    %12 = arith.divf %10, %11 : vector<1x384xf32>
    %13 = vector.broadcast %12 : vector<1x384xf32> to vector<8x384xf32>
    %14 = arith.subf %6, %13 : vector<8x384xf32>
    %15 = arith.mulf %14, %14 : vector<8x384xf32>
    %cst_15 = arith.constant dense<0.000000e+00> : vector<384xf32>
    %16 = vector.multi_reduction <add>, %15, %cst_15 [0] : vector<8x384xf32> to vector<384xf32>
    %17 = vector.shape_cast %16 : vector<384xf32> to vector<1x384xf32>
    %cst_16 = arith.constant 8.000000e+00 : f32
    %18 = vector.broadcast %cst_16 : f32 to vector<1x384xf32>
    %19 = arith.divf %17, %18 : vector<1x384xf32>
    %cst_17 = arith.constant 9.99999974E-6 : f32
    %20 = vector.broadcast %cst_17 : f32 to vector<1x384xf32>
    %21 = arith.addf %19, %20 : vector<1x384xf32>
    %22 = math.rsqrt %21 : vector<1x384xf32>
    %23 = vector.broadcast %22 : vector<1x384xf32> to vector<8x384xf32>
    %24 = arith.mulf %14, %23 : vector<8x384xf32>
    %25 = vector.broadcast %7 : vector<1x384xf32> to vector<8x384xf32>
    %26 = arith.mulf %24, %25 : vector<8x384xf32>
    %27 = vector.broadcast %8 : vector<1x384xf32> to vector<8x384xf32>
    %28 = arith.addf %26, %27 : vector<8x384xf32>
    %29 = arith.truncf %28 : vector<8x384xf32> to vector<8x384xbf16>
    %c0_18 = arith.constant 0 : index
    %c0_19 = arith.constant 0 : index
    %30 = vector.load %arg3[%c0_18, %c0_19] : memref<384x384xbf16, #tpu.memory_space<vmem>>, vector<384x384xbf16>
    %cst_20 = arith.constant dense<0.000000e+00> : vector<8x384xf32>
    %31 = tpu.matmul %29, %30, %cst_20 {dimension_numbers = #tpu.dot_dimension_numbers<[1], [0], [0], [1], [0, 0, 1, 1], [], []>} : vector<8x384xbf16>, vector<384x384xbf16>, vector<8x384xf32> -> vector<8x384xf32>
    %c2 = arith.constant 2 : index
    %c0_21 = arith.constant 0 : index
    %32 = vector.load %arg2[%c2, %c0_21] : memref<8x384xf32, #tpu.memory_space<vmem>>, vector<1x384xf32>
    %33 = vector.broadcast %32 : vector<1x384xf32> to vector<8x384xf32>
    %34 = arith.addf %31, %33 : vector<8x384xf32>
    %cst_22 = arith.constant 0.000000e+00 : f32
    %35 = vector.broadcast %cst_22 : f32 to vector<8x384xf32>
    %36 = arith.maximumf %34, %35 : vector<8x384xf32>
    %37 = arith.truncf %36 : vector<8x384xf32> to vector<8x384xbf16>
    %c0_23 = arith.constant 0 : index
    %c0_24 = arith.constant 0 : index
    %38 = vector.load %arg4[%c0_23, %c0_24] : memref<384x128xbf16, #tpu.memory_space<vmem>>, vector<384x128xbf16>
    %cst_25 = arith.constant dense<0.000000e+00> : vector<8x128xf32>
    %39 = tpu.matmul %37, %38, %cst_25 {dimension_numbers = #tpu.dot_dimension_numbers<[1], [0], [0], [1], [0, 0, 1, 1], [], []>} : vector<8x384xbf16>, vector<384x128xbf16>, vector<8x128xf32> -> vector<8x128xf32>
    %c3 = arith.constant 3 : index
    %c0_26 = arith.constant 0 : index
    %40 = vector.load %arg2[%c3, %c0_26] : memref<8x384xf32, #tpu.memory_space<vmem>>, vector<1x128xf32>
    %41 = vector.broadcast %40 : vector<1x128xf32> to vector<8x128xf32>
    %42 = arith.addf %39, %41 : vector<8x128xf32>
    %cst_27 = arith.constant 0.000000e+00 : f32
    %43 = vector.broadcast %cst_27 : f32 to vector<8x128xf32>
    %44 = arith.maximumf %42, %43 : vector<8x128xf32>
    %c4 = arith.constant 4 : index
    %c0_28 = arith.constant 0 : index
    %45 = vector.load %arg2[%c4, %c0_28] : memref<8x384xf32, #tpu.memory_space<vmem>>, vector<1x128xf32>
    %46 = vector.broadcast %45 : vector<1x128xf32> to vector<8x128xf32>
    %47 = arith.mulf %44, %46 : vector<8x128xf32>
    %cst_29 = arith.constant dense<0.000000e+00> : vector<8xf32>
    %48 = vector.multi_reduction <add>, %47, %cst_29 [1] : vector<8x128xf32> to vector<8xf32>
    %49 = vector.shape_cast %48 : vector<8xf32> to vector<8x1xf32>
    %c5 = arith.constant 5 : index
    %c0_30 = arith.constant 0 : index
    %50 = vector.load %arg2[%c5, %c0_30] : memref<8x384xf32, #tpu.memory_space<vmem>>, vector<1x1xf32>
    %51 = vector.broadcast %50 : vector<1x1xf32> to vector<8x1xf32>
    %52 = arith.addf %49, %51 : vector<8x1xf32>
    %c0_31 = arith.constant 0 : index
    %c0_32 = arith.constant 0 : index
    %53 = vector.load %arg5[%c0_31, %c0_32] : memref<8x1xf32, #tpu.memory_space<vmem>>, vector<8x1xf32>
    tpu.vector_store %arg5[%c0_31, %c0_32], %52 {strides = array<i32>} : memref<8x1xf32, #tpu.memory_space<vmem>>, vector<8x1xf32>,
    return
  }
}

</mosaic_0001>

<bundles_post_ra>
// kernel: tpu_custom_call.1
= control target key start
LH: loop header
LB: loop body
LE: loop exit
PB: predicated region body
PF: predicated region fallthrough
CT: control target
= control target key end

     0   :  { %10 = vsyncpa [#allocation4], 0  ;;  %s1733_s0 = inlined_call_operand.hbm [shape: f32[8,352], index: 0, kind: input, shape index: {}]   ;;  %s1734_s1 = inlined_call_operand.hbm [shape: f32[8,9], index: 1, kind: input, shape index: {}]   ;;  %s1735_s2 = inlined_call_operand.hbm [shape: f32[8,384], index: 2, kind: input, shape index: {}]   ;;  %s1736_s3 = inlined_call_operand.hbm [shape: bf16[384,384], index: 3, kind: input, shape index: {}]   ;;  %s1737_s4 = inlined_call_operand.hbm [shape: bf16[384,128], index: 4, kind: input, shape index: {}]   ;;  %s1738_s5 = inlined_call_operand.vmem [shape: f32[8,1], index: 5, kind: output, shape index: {}]  }
   0x1   :  { %11 = vsyncpa [#allocation6], 0 }
   0x2   :  { %12 = vsyncpa [#allocation9], 0  ;;  %s1603_s18 = smov [#allocation5]   ;;  %s1604_s20 = smov [#allocation8]  }
   0x3   :  { %s29_s19 = sshll.u32 %s1603_s18, 4  ;;  %s48_s21 = sshll.u32 %s1604_s20, 4  ;;  %s30_s19 = int_to_ptr.vmem [resolvable:$true] %s29_s19  ;;  %s49_s21 = int_to_ptr.vmem [resolvable:$true] %s48_s21 }
   0x4   :  { %s1505_s22 = scalar_lea.vmem %s30_s19, 128  ;;  %p1510_p1 = scmp.lt.s32.totalorder %s30_s19, %s30_s19 }
   0x5   :  { %p1506_p0 = scmp.ne.s32.totalorder %s30_s19, %s1505_s22  ;;  %p1511_p2 = scmp.lt.s32.totalorder %s1505_s22, %s1505_s22 }
   0x7   :  { %p1512_p3 = por %p1511_p2, %p1510_p1 }
   0x9   :  { %p1513_p4 = pnand %p1512_p3, %p1506_p0 }
   0xb   :  { %1516 = shalt.err (!%p1513_p4)
}
   0xc   :  { %32 = dma.hbm_to_vmem [thread:$0]  %s1734_s1, 128, %s30_s19, [#allocation6]  }
   0xd   :  { %s1525_s25 = scalar_lea.vmem %s49_s21, 9216  ;;  %p1530_p6 = scmp.lt.s32.totalorder %s49_s21, %s49_s21 }
   0xe   :  { %p1526_p5 = scmp.ne.s32.totalorder %s49_s21, %s1525_s25  ;;  %p1531_p7 = scmp.lt.s32.totalorder %s1525_s25, %s1525_s25 }
  0x10   :  { %p1532_p8 = por %p1531_p7, %p1530_p6 }
  0x12   :  { %p1533_p9 = pnand %p1532_p8, %p1526_p5 }
  0x14   :  { %1536 = shalt.err (!%p1533_p9)
}
  0x15   :  { %s1605_s26 = smov 192   ;;  %s1606_s27 = smov 12  }
  0x16   :  { %54 = dma.hbm_to_vmem [thread:$0]  %s1736_s3, 9216, %s49_s21, [#allocation9], %s1605_s26, %s1605_s26, %s1606_s27  }
  0x17   :  { %s1607_s30 = smov [#allocation3]   ;;  %s1608_s7 = smov [#allocation7]  }
  0x18   :  { %s19_s6 = sshll.u32 %s1607_s30, 4  ;;  %s39_s8 = sshll.u32 %s1608_s7, 4  ;;  %s20_s6 = int_to_ptr.vmem [resolvable:$true] %s19_s6  ;;  %s40_s8 = int_to_ptr.vmem [resolvable:$true] %s39_s8 }
  0x19   :  { %s1545_s1 = scalar_lea.vmem %s20_s6, 384  ;;  %p1550_p11 = scmp.lt.s32.totalorder %s20_s6, %s20_s6 }
  0x1a   :  { %p1546_p10 = scmp.ne.s32.totalorder %s20_s6, %s1545_s1  ;;  %p1551_p12 = scmp.lt.s32.totalorder %s1545_s1, %s1545_s1 }
  0x1c   :  { %p1552_p13 = por %p1551_p12, %p1550_p11 }
  0x1e   :  { %p1553_p0 = pnand %p1552_p13, %p1546_p10 }
  0x20   :  { %1556 = shalt.err (!%p1553_p0)
}
  0x21   :  { %22 = dma.hbm_to_vmem [thread:$0]  %s1733_s0, 384, %s20_s6, [#allocation4]  }
  0x22   :  { %s1565_s11 = scalar_lea.vmem %s40_s8, 384  ;;  %p1570_p2 = scmp.lt.s32.totalorder %s40_s8, %s40_s8 }
  0x23   :  { %p1566_p1 = scmp.ne.s32.totalorder %s40_s8, %s1565_s11  ;;  %p1571_p3 = scmp.lt.s32.totalorder %s1565_s11, %s1565_s11 }
  0x25   :  { %p1572_p4 = por %p1571_p3, %p1570_p2 }
  0x27   :  { %p1573_p5 = pnand %p1572_p4, %p1566_p1 }
  0x29   :  { %1576 = shalt.err (!%p1573_p5)
}
  0x2a   :  { %42 = dma.hbm_to_vmem [thread:$0]  %s1735_s2, 384, %s40_s8, [#allocation6]  }
  0x2b   :  { %s1609_s13 = smov [#allocation10]  }
  0x2c   :  { %s60_s14 = sshll.u32 %s1609_s13, 4  ;;  %s61_s14 = int_to_ptr.vmem [resolvable:$true] %s60_s14 }
  0x2d   :  { %s1585_s15 = scalar_lea.vmem %s61_s14, 3072  ;;  %p1590_p7 = scmp.lt.s32.totalorder %s61_s14, %s61_s14 }
  0x2e   :  { %p1586_p6 = scmp.ne.s32.totalorder %s61_s14, %s1585_s15  ;;  %p1591_p8 = scmp.lt.s32.totalorder %s1585_s15, %s1585_s15 }
  0x30   :  { %p1592_p9 = por %p1591_p8, %p1590_p7 }
  0x32   :  { %p1593_p10 = pnand %p1592_p9, %p1586_p6 }
  0x34   :  { %1596 = shalt.err (!%p1593_p10)
}
  0x35   :  { %s1610_s0 = smov 64   ;;  %s1611_s16 = smov 4  }
  0x36   :  { %66 = dma.hbm_to_vmem [thread:$0]  %s1737_s4, 3072, %s61_s14, [#allocation9], %s1610_s0, %s1610_s0, %s1611_s16  }
  0x37   :  { %1597 = dma.done.wait [#allocation4], 384  }
  0x38   :  { %1598 = vsyncadd [#allocation4], 4294966912 }
  0x39   :  { %1599 = dma.done.wait [#allocation6], 512  }
  0x3a   :  { %1600 = vsyncadd [#allocation6], 4294966784 }
  0x3b   :  { %1601 = dma.done.wait [#allocation9], 12288  }
  0x3c   :  { %1602 = vsyncadd [#allocation9], 4294955008  ;;  %v1612_v0 = vmov 0.0   ;;  %v1613_v1 = vmov 0   ;;  %v93_v2 = vld [vmem:[#allocation5] sm:$0xff]  ;;  %s1614_s2 = smov 96  }
  0x3d   :  { %85 = vst [vmem:[#allocation2 + $0x10] sm:$0xff] %v1612_v0  ;;  %776 = vmatprep.mubr.bf16.mxu1 %v1613_v1  ;;  %95 = vrot.lane.b32.xlu0 %v93_v2, %s1614_s2  ;;  %v1371_v3 = vld [vmem:[#allocation8 + $0xac] ss:$12 sps:$4 sm:$0xff]   ;;  %v1373_v4 = vld [vmem:[#allocation8 + $0xa8] ss:$12 sps:$4 sm:$0xff]   ;;  %vm91_vm0 = vcmask 785408  }
  0x3e   :  { %v1374_v5 = vld [vmem:[#allocation8 + $0x94] ss:$12 sps:$4 sm:$0xff]   ;;  %703 = vmatprep.subr.bf16.mxu0 %v1371_v3  ;;  %v1376_v6 = vld [vmem:[#allocation8 + $0x90] ss:$12 sps:$4 sm:$0xff]   ;;  %v1379_v8 = vld [vmem:[#allocation8 + $0x78] ss:$12 sps:$4 sm:$0xff]  }
  0x3f   :  { %704 = vmatpush1.bf16.msra.mxu0 %v1373_v4  ;;  %v1377_v7 = vld [vmem:[#allocation8 + $0x7c] ss:$12 sps:$4 sm:$0xff]   ;;  %v1380_v9 = vld [vmem:[#allocation8 + $0x64] ss:$12 sps:$4 sm:$0xff]   ;;  %v1382_v11 = vld [vmem:[#allocation8 + $0x60] ss:$12 sps:$4 sm:$0xff]  }
  0x40   :  { %705 = vmatprep.subr.bf16.mxu0 %v1374_v5  ;;  %v88_v10 = vld [vmem:[#allocation3 + $0x10] sm:$0xff]  ;;  %v1385_v13 = vld [vmem:[#allocation8 + $0x48] ss:$12 sps:$4 sm:$0xff]   ;;  %v1392_v21 = vld [vmem:[#allocation8 + $0x4] ss:$12 sps:$4 sm:$0xff]   ;;  %vm1615_vm1 = vmmov 0  }
  0x41   :  { %92 = vst.msk [vmem:[#allocation2 + $0x10] sm:$0xff] %vm91_vm0, %v88_v10  ;;  %v1383_v12 = vld [vmem:[#allocation8 + $0x4c] ss:$12 sps:$4 sm:$0xff]   ;;  %v1386_v14 = vld [vmem:[#allocation8 + $0x34] ss:$12 sps:$4 sm:$0xff]   ;;  %vm98_vm2 = vcmask 859904  }
  0x42   :  { %v1388_v15 = vld [vmem:[#allocation8 + $0x30] ss:$12 sps:$4 sm:$0xff]   ;;  %v1419_v17 = vld [vmem:[#allocation8 + $0x22c] ss:$12 sps:$4 sm:$0xff]   ;;  %v1421_v20 = vld [vmem:[#allocation8 + $0x228] ss:$12 sps:$4 sm:$0xff]  }
  0x43   :  { %706 = vmatpush1.bf16.msra.mxu0 %v1376_v6  ;;  %v1389_v16 = vld [vmem:[#allocation8 + $0x1c] ss:$12 sps:$4 sm:$0xff]   ;;  %v1391_v18 = vld [vmem:[#allocation8 + $0x18] ss:$12 sps:$4 sm:$0xff]   ;;  %v87_v19 = vld [vmem:[#allocation3 + $0x8] sm:$0xff]  ;;  %744 = vmatprep.subr.bf16.mxu1 %v1419_v17  ;;  %vm1151_vm3 = vcmask 7168  }
  0x44   :  { %707 = vmatprep.subr.bf16.mxu0 %v1377_v7  ;;  %v112_v22 = vrot.slane %v87_v19, 4  ;;  %v86_v23 = vld [vmem:[#allocation3] sm:$0xff]  ;;  %745 = vmatpush1.bf16.msra.mxu1 %v1421_v20  ;;  %v1423_v27 = vld [vmem:[#allocation8 + $0x214] ss:$12 sps:$4 sm:$0xff]   ;;  %v1425_v28 = vld [vmem:[#allocation8 + $0x210] ss:$12 sps:$4 sm:$0xff]  }
  0x45   :  { %v106_v24 = vrot.slane %v86_v23, 4  ;;  %v1394_v25 = vld [vmem:[#allocation8] ss:$12 sps:$4 sm:$0xff]   ;;  %746 = vmatprep.subr.bf16.mxu1 %v1423_v27  ;;  %v1427_v32 = vld [vmem:[#allocation8 + $0x1fc] ss:$12 sps:$4 sm:$0xff]  }
  0x46   :  { %v113_v26 = vadd.f32 %v112_v22, %v87_v19  ;;  %v1395_v29 = vld [vmem:[#allocation8 + $0x16c] ss:$12 sps:$4 sm:$0xff]   ;;  %v1431_v37 = vld [vmem:[#allocation8 + $0x1e4] ss:$12 sps:$4 sm:$0xff]   ;;  %v1397_v38 = vld [vmem:[#allocation8 + $0x168] ss:$12 sps:$4 sm:$0xff]  }
  0x47   :  { %708 = vmatpush1.bf16.msra.mxu0 %v1379_v8  ;;  %v107_v30 = vadd.f32 %v106_v24, %v86_v23  ;;  %v1429_v34 = vld [vmem:[#allocation8 + $0x1f8] ss:$12 sps:$4 sm:$0xff]   ;;  %v1398_v40 = vld [vmem:[#allocation8 + $0x154] ss:$12 sps:$4 sm:$0xff]   ;;  %v1400_v45 = vld [vmem:[#allocation8 + $0x150] ss:$12 sps:$4 sm:$0xff]  }
  0x48   :  { %709 = vmatprep.subr.bf16.mxu0 %v1380_v9  ;;  %v114_v31 = vrot.slane %v113_v26, 2  ;;  %747 = vmatpush1.bf16.msra.mxu1 %v1425_v28  ;;  %v1433_v42 = vld [vmem:[#allocation8 + $0x1e0] ss:$12 sps:$4 sm:$0xff]   ;;  %v1401_v47 = vld [vmem:[#allocation8 + $0x13c] ss:$12 sps:$4 sm:$0xff]  }
  0x49   :  { %v108_v33 = vrot.slane %v107_v30, 2  ;;  %748 = vmatprep.subr.bf16.mxu1 %v1427_v32  ;;  %v1435_v44 = vld [vmem:[#allocation8 + $0x1cc] ss:$12 sps:$4 sm:$0xff]   ;;  %v1437_v50 = vld [vmem:[#allocation8 + $0x1c8] ss:$12 sps:$4 sm:$0xff]  }
  0x4a   :  { %v115_v35 = vadd.f32 %v114_v31, %v113_v26  ;;  %v1439_v52 = vld [vmem:[#allocation8 + $0x1b4] ss:$12 sps:$4 sm:$0xff]   ;;  %v1403_v53 = vld [vmem:[#allocation8 + $0x138] ss:$12 sps:$4 sm:$0xff]   ;;  %v1441_v57 = vld [vmem:[#allocation8 + $0x1b0] ss:$12 sps:$4 sm:$0xff]   ;;  %v165_v26 = vlaneseq }
  0x4b   :  { %710 = vmatpush1.bf16.msra.mxu0 %v1382_v11  ;;  %v109_v36 = vadd.f32 %v108_v33, %v107_v30  ;;  %v1404_v55 = vld [vmem:[#allocation8 + $0x124] ss:$12 sps:$4 sm:$0xff]   ;;  %v1443_v59 = vld [vmem:[#allocation8 + $0x19c] ss:$12 sps:$4 sm:$0xff]   ;;  %v1406_v60 = vld [vmem:[#allocation8 + $0x120] ss:$12 sps:$4 sm:$0xff]  }
  0x4c   :  { %711 = vmatprep.subr.bf16.mxu0 %v1383_v12  ;;  %v116_v39 = vrot.slane %v115_v35, 1  ;;  %749 = vmatpush1.bf16.msra.mxu1 %v1429_v34  ;;  %v1407_v62 = vld [vmem:[#allocation8 + $0x10c] ss:$12 sps:$4 sm:$0xff]   ;;  %v1447_v3 = vld [vmem:[#allocation8 + $0x184] ss:$12 sps:$4 sm:$0xff]   ;;  %v1670_v27 = vshrl.u32 %v165_v26, 7 }
  0x4d   :  { %v110_v41 = vrot.slane %v109_v36, 1  ;;  %750 = vmatprep.subr.bf16.mxu1 %v1431_v37  ;;  %v1445_v1 = vld [vmem:[#allocation8 + $0x198] ss:$12 sps:$4 sm:$0xff]   ;;  %v1409_v5 = vld [vmem:[#allocation8 + $0x108] ss:$12 sps:$4 sm:$0xff]  }
  0x4e   :  { %v117_v43 = vadd.f32 %v116_v39, %v115_v35  ;;  %v1410_v7 = vld [vmem:[#allocation8 + $0xf4] ss:$12 sps:$4 sm:$0xff]   ;;  %v1412_v12 = vld [vmem:[#allocation8 + $0xf0] ss:$12 sps:$4 sm:$0xff]   ;;  %v1679_v30 = vsub.s32 0, %v1670_v27 }
  0x4f   :  { %712 = vmatpush1.bf16.msra.mxu0 %v1385_v13  ;;  %v111_v46 = vadd.f32 %v110_v41, %v109_v36  ;;  %v1449_v9 = vld [vmem:[#allocation8 + $0x180] ss:$12 sps:$4 sm:$0xff]   ;;  %v1413_v17 = vld [vmem:[#allocation8 + $0xdc] ss:$12 sps:$4 sm:$0xff]  }
  0x50   :  { %713 = vmatprep.subr.bf16.mxu0 %v1386_v14  ;;  %v126_v48 = vmul.f32 0.125, %v117_v43  ;;  %751 = vmatpush1.bf16.msra.mxu1 %v1433_v42  ;;  %v1451_v14 = vld [vmem:[#allocation8 + $0x170] ss:$12 sps:$4 sm:$0xff]  }
  0x51   :  { %v125_v49 = vmul.f32 0.125, %v111_v46  ;;  %752 = vmatprep.subr.bf16.mxu1 %v1435_v44  ;;  %v1672_v28 = vld [vmem:[#allocation7] ss:$8 sm:$0x7] }
  0x52   :  { %v1662_v51 = vsub.f32 %v87_v19, %v126_v48  ;;  %v1415_v19 = vld [vmem:[#allocation8 + $0xd8] ss:$12 sps:$4 sm:$0xff]   ;;  %v168_v34 = vrot.slane %v1672_v28, %v1679_v30  ;;  %v1430_v48 = vld [vmem:[#allocation8 + $0x200] ss:$12 sps:$4 sm:$0xff]   ;;  %v1460_v26 = vld [vmem:[#allocation8 + $0x50] ss:$12 sps:$4 sm:$0xff]  }
  0x53   :  { %714 = vmatpush1.bf16.msra.mxu0 %v1388_v15  ;;  %v1664_v54 = vsub.f32 %v86_v23, %v125_v49  ;;  %v1416_v23 = vld [vmem:[#allocation8 + $0xc4] ss:$12 sps:$4 sm:$0xff]   ;;  %v1434_v49 = vld [vmem:[#allocation8 + $0x1e8] ss:$12 sps:$4 sm:$0xff]  }
  0x54   :  { %715 = vmatprep.subr.bf16.mxu0 %v1389_v16  ;;  %v132_v56 = vmul.f32 %v1662_v51, %v1662_v51  ;;  %753 = vmatpush1.bf16.msra.mxu1 %v1437_v50  ;;  %v1681_v31 = vld [vmem:[#allocation7 + $0x1] ss:$8 sm:$0x7] }
  0x55   :  { %v131_v58 = vmul.f32 %v1664_v54, %v1664_v54  ;;  %754 = vmatprep.subr.bf16.mxu1 %v1439_v52  ;;  %v187_v39 = vrot.slane %v1681_v31, %v1679_v30  ;;  %v1438_v50 = vld [vmem:[#allocation8 + $0x1d0] ss:$12 sps:$4 sm:$0xff]   ;;  %v1446_v52 = vld [vmem:[#allocation8 + $0x1a0] ss:$12 sps:$4 sm:$0xff]  }
  0x56   :  { %v140_v61 = vrot.slane %v132_v56, 4 }
  0x57   :  { %716 = vmatpush1.bf16.msra.mxu0 %v1391_v18  ;;  %v134_v63 = vrot.slane %v131_v58, 4 }
  0x58   :  { %717 = vmatprep.subr.bf16.mxu0 %v1392_v21  ;;  %v141_v2 = vadd.f32 %v140_v61, %v132_v56  ;;  %755 = vmatpush1.bf16.msra.mxu1 %v1441_v57 }
  0x59   :  { %v135_v4 = vadd.f32 %v134_v63, %v131_v58  ;;  %756 = vmatprep.subr.bf16.mxu1 %v1443_v59 }
  0x5a   :  { %v142_v6 = vrot.slane %v141_v2, 2 }
  0x5b   :  { %718 = vmatpush1.bf16.msra.mxu0 %v1394_v25  ;;  %v136_v8 = vrot.slane %v135_v4, 2  ;;  %v1418_v25 = vld [vmem:[#allocation8 + $0xc0] ss:$12 sps:$4 sm:$0xff]  }
  0x5c   :  { %719 = vmatprep.subr.bf16.mxu0 %v1395_v29  ;;  %v143_v10 = vadd.f32 %v142_v6, %v141_v2  ;;  %757 = vmatpush1.bf16.msra.mxu1 %v1445_v1  ;;  %v1676_v29 = vsub.s32 1, %v1670_v27 }
  0x5d   :  { %v137_v11 = vadd.f32 %v136_v8, %v135_v4  ;;  %758 = vmatprep.subr.bf16.mxu1 %v1447_v3 }
  0x5e   :  { %v144_v13 = vrot.slane %v143_v10, 1  ;;  %v172_v32 = vrot.slane %v1672_v28, %v1676_v29  ;;  %v191_v37 = vrot.slane %v1681_v31, %v1676_v29 }
  0x5f   :  { %720 = vmatpush2.bf16.msra.mxu0 %v1397_v38  ;;  %v138_v15 = vrot.slane %v137_v11, 1 }
  0x60   :  { %721 = vmatprep.subr.bf16.mxu0 %v1398_v40  ;;  %v145_v16 = vadd.f32 %v144_v13, %v143_v10  ;;  %759 = vmatpush1.bf16.msra.mxu1 %v1449_v9  ;;  %v1710_v10 = vsub.s32 2, %v1670_v27  ;;  %v1461_v27 = vld [vmem:[#allocation8 + $0xf8] ss:$12 sps:$4 sm:$0xff]  }
  0x61   :  { %v139_v18 = vadd.f32 %v138_v15, %v137_v11  ;;  %1256 = vmatprep.subr.bf16.mxu1 %v1451_v14 }
  0x62   :  { %v153_v20 = vmul.f32 0.125, %v145_v16  ;;  %v176_v11 = vrot.slane %v1672_v28, %v1710_v10  ;;  %v195_v14 = vrot.slane %v1681_v31, %v1710_v10  ;;  %v1462_v28 = vld [vmem:[#allocation8 + $0x38] ss:$12 sps:$4 sm:$0xff]   ;;  %v1463_v31 = vld [vmem:[#allocation8 + $0xe0] ss:$12 sps:$4 sm:$0xff]  }
  0x63   :  { %722 = vmatpush2.bf16.msra.mxu0 %v1400_v45  ;;  %v152_v21 = vmul.f32 0.125, %v139_v18  ;;  %v1422_v45 = vld [vmem:[#allocation8 + $0x230] ss:$12 sps:$4 sm:$0xff]  }
  0x64   :  { %723 = vmatprep.subr.bf16.mxu0 %v1401_v47  ;;  %v156_v22 = vadd.f32 1e-05, %v153_v20  ;;  %v1426_v47 = vld [vmem:[#allocation8 + $0x218] ss:$12 sps:$4 sm:$0xff]  }
  0x65   :  { %v155_v24 = vadd.f32 1e-05, %v152_v21  ;;  %v1454_v20 = vld [vmem:[#allocation8 + $0x98] ss:$12 sps:$4 sm:$0xff]   ;;  %v1455_v21 = vld [vmem:[#allocation8 + $0x140] ss:$12 sps:$4 sm:$0xff]  }
  0x66   :  { %1491 = vrsqrt.f32 %v156_v22  ;;  %v1456_v22 = vld [vmem:[#allocation8 + $0x80] ss:$12 sps:$4 sm:$0xff]  }
  0x67   :  { %724 = vmatpush2.bf16.msra.mxu0 %v1403_v53  ;;  %1493 = vrsqrt.f32 %v155_v24  ;;  %v1450_v53 = vld [vmem:[#allocation8 + $0x188] ss:$12 sps:$4 sm:$0xff]  }
  0x68   :  { %725 = vmatprep.subr.bf16.mxu0 %v1404_v55  ;;  %v1458_v24 = vld [vmem:[#allocation8 + $0x68] ss:$12 sps:$4 sm:$0xff]  }
  0x6b   :  { %726 = vmatpush2.bf16.msra.mxu0 %v1406_v60 }
  0x6c   :  { %727 = vmatprep.subr.bf16.mxu0 %v1407_v62 }
  0x6f   :  { %728 = vmatpush2.bf16.msra.mxu0 %v1409_v5 }
  0x70   :  { %729 = vmatprep.subr.bf16.mxu0 %v1410_v7 }
  0x73   :  { %730 = vmatpush2.bf16.msra.mxu0 %v1412_v12  ;;  %v1492_v33 = vpop.eup %1491 }
  0x74   :  { %731 = vmatprep.subr.bf16.mxu0 %v1413_v17  ;;  %v1494_v35 = vpop.eup %1493  ;;  %v162_v36 = vmul.f32 %v1492_v33, %v1662_v51  ;;  %v1442_v51 = vld [vmem:[#allocation8 + $0x1b8] ss:$12 sps:$4 sm:$0xff]   ;;  %v1452_v17 = vld [vmem:[#allocation8 + $0xb0] ss:$12 sps:$4 sm:$0xff]   ;;  %v1465_v33 = vld [vmem:[#allocation8 + $0xc8] ss:$12 sps:$4 sm:$0xff]  }
  0x75   :  { %v161_v38 = vmul.f32 %v1494_v35, %v1664_v54  ;;  %v1467_v35 = vld [vmem:[#allocation10 + $0x78] sm:$0xff]  }
  0x76   :  { %v181_v40 = vmul.f32 %v172_v32, %v162_v36  ;;  %v1464_v32 = vld [vmem:[#allocation8 + $0x20] ss:$12 sps:$4 sm:$0xff]   ;;  %v1468_v36 = vld [vmem:[#allocation10 + $0x38] sm:$0xff]  }
  0x77   :  { %732 = vmatpush2.bf16.msra.mxu0 %v1415_v19  ;;  %v180_v41 = vmul.f32 %v168_v34, %v161_v38  ;;  %v1453_v19 = vld [vmem:[#allocation8 + $0x158] ss:$12 sps:$4 sm:$0xff]   ;;  %v1466_v34 = vld [vmem:[#allocation8 + $0x8] ss:$12 sps:$4 sm:$0xff]  }
  0x78   :  { %733 = vmatprep.subr.bf16.mxu0 %v1416_v23  ;;  %v200_v42 = vadd.f32 %v191_v37, %v181_v40  ;;  %v1457_v23 = vld [vmem:[#allocation8 + $0x128] ss:$12 sps:$4 sm:$0xff]  }
  0x79   :  { %v199_v43 = vadd.f32 %v187_v39, %v180_v41  ;;  %v1469_v37 = vld [vmem:[#allocation10 + $0x70] sm:$0xff]   ;;  %v1471_v39 = vld [vmem:[#allocation10 + $0x68] sm:$0xff]   ;;  %v1473_v41 = vld [vmem:[#allocation10 + $0x60] sm:$0xff]  }
  0x7a   :  { %v1693_v44 = vpack.c.bf16 %v200_v42, %v200_v42  ;;  %v1470_v38 = vld [vmem:[#allocation10 + $0x30] sm:$0xff]   ;;  %v1472_v40 = vld [vmem:[#allocation10 + $0x28] sm:$0xff]   ;;  %v1474_v42 = vld [vmem:[#allocation10 + $0x20] sm:$0xff]  }
  0x7b   :  { %734 = vmatpush2.bf16.msra.mxu0 %v1418_v25  ;;  %v1695_v46 = vpack.c.bf16 %v199_v43, %v199_v43  ;;  %v1459_v25 = vld [vmem:[#allocation8 + $0x110] ss:$12 sps:$4 sm:$0xff]  }
  0x7c   :  { %1318 = vmatprep.subr.bf16.mxu0 %v1612_v0  ;;  %735 = vmatprep.mubr.bf16.mxu0 %v1693_v44  ;;  %v1475_v43 = vld [vmem:[#allocation10 + $0x58] sm:$0xff]  }
  0x7e   :  { %736 = vmatmul.mubr.bf16.vlgmr.msra.gmra.mxu0 %v1695_v46 }
  0x7f   :  { %1319 = vmatpush3.bf16.msra.mxu0 %v1422_v45  ;;  %1334 = vmatprep.mubr.msk.bf16.mxu0 %vm1615_vm1, %v1612_v0  ;;  %v1477_v45 = vld [vmem:[#allocation10 + $0x50] sm:$0xff]  }
  0x80   :  { %1320 = vmatprep.subr.bf16.mxu0 %v1612_v0 }
  0x83   :  { %1321 = vmatpush3.bf16.msra.mxu0 %v1426_v47  ;;  %v1478_v47 = vld [vmem:[#allocation10 + $0x10] sm:$0xff]  }
  0x84   :  { %1322 = vmatprep.subr.bf16.mxu0 %v1612_v0 }
  0x87   :  { %1323 = vmatpush3.bf16.msra.mxu0 %v1430_v48  ;;  %v1480_v48 = vld [vmem:[#allocation10 + $0x8] sm:$0xff]  }
  0x88   :  { %1324 = vmatprep.subr.bf16.mxu0 %v1612_v0 }
  0x8b   :  { %1325 = vmatpush3.bf16.msra.mxu0 %v1434_v49  ;;  %v1481_v49 = vld [vmem:[#allocation10 + $0x40] sm:$0xff]  }
  0x8c   :  { %1326 = vmatprep.subr.bf16.mxu0 %v1612_v0 }
  0x8f   :  { %1327 = vmatpush3.bf16.msra.mxu0 %v1438_v50  ;;  %v1482_v50 = vld [vmem:[#allocation10] sm:$0xff]  }
  0x90   :  { %1328 = vmatprep.subr.bf16.mxu0 %v1612_v0 }
  0x93   :  { %1329 = vmatpush3.bf16.msra.mxu0 %v1442_v51  ;;  %v1483_v51 = vld [vmem:[#allocation10 + $0xb8] sm:$0xff]  }
  0x94   :  { %1330 = vmatprep.subr.bf16.mxu0 %v1612_v0 }
  0x97   :  { %1331 = vmatpush3.bf16.msra.mxu0 %v1446_v52  ;;  %v1484_v52 = vld [vmem:[#allocation10 + $0xb0] sm:$0xff]  }
  0x98   :  { %1332 = vmatprep.subr.bf16.mxu0 %v1612_v0 }
  0x9b   :  { %1333 = vmatpush3.bf16.msra.mxu0 %v1450_v53  ;;  %v1485_v53 = vld [vmem:[#allocation10 + $0xa8] sm:$0xff]  }
  0x9c   :  { %1338 = vmatprep.subr.bf16.mxu0 %v1612_v0 }
  0xaf   :  { %v96_v54 = vpop.permute.xlu0 %95 }
  0xb0   :  { %99 = vst.msk [vmem:[#allocation2 + $0x10] sm:$0xff] %vm98_vm2, %v96_v54  ;;  %v1486_v54 = vld [vmem:[#allocation10 + $0xa0] sm:$0xff]  }
  0xb7   :  { %v102_v55 = vld [vmem:[#allocation2 + $0x10] sm:$0xff] }
  0xb8   :  { %v118_v56 = vrot.slane %v102_v55, 4 }
  0xba   :  { %v119_v57 = vadd.f32 %v118_v56, %v102_v55 }
  0xbc   :  { %v120_v58 = vrot.slane %v119_v57, 2 }
  0xbe   :  { %v121_v59 = vadd.f32 %v120_v58, %v119_v57  ;;  %v1488_v58 = vld [vmem:[#allocation10 + $0x90] sm:$0xff]  }
  0xc0   :  { %v122_v60 = vrot.slane %v121_v59, 1 }
  0xc2   :  { %v123_v61 = vadd.f32 %v122_v60, %v121_v59 }
  0xc4   :  { %v127_v62 = vmul.f32 0.125, %v123_v61  ;;  %v1489_v61 = vld [vmem:[#allocation10 + $0x88] sm:$0xff]  }
  0xc6   :  { %v130_v63 = vsub.f32 %v102_v55, %v127_v62  ;;  %v1487_v55 = vld [vmem:[#allocation10 + $0x98] sm:$0xff]   ;;  %v1490_v62 = vld [vmem:[#allocation10 + $0x80] sm:$0xff]  }
  0xc8   :  { %v133_v1 = vmul.f32 %v130_v63, %v130_v63 }
  0xca   :  { %v146_v2 = vrot.slane %v133_v1, 4 }
  0xcc   :  { %v147_v3 = vadd.f32 %v146_v2, %v133_v1 }
  0xce   :  { %v148_v4 = vrot.slane %v147_v3, 2 }
  0xd0   :  { %v149_v5 = vadd.f32 %v148_v4, %v147_v3 }
  0xd2   :  { %v150_v6 = vrot.slane %v149_v5, 1 }
  0xd4   :  { %v151_v7 = vadd.f32 %v150_v6, %v149_v5 }
  0xd6   :  { %v154_v8 = vmul.f32 0.125, %v151_v7 }
  0xd8   :  { %v157_v9 = vadd.f32 1e-05, %v154_v8 }
  0xda   :  { %1495 = vrsqrt.f32 %v157_v9 }
  0xe7   :  { %v1496_v12 = vpop.eup %1495 }
  0xe8   :  { %v163_v13 = vmul.f32 %v1496_v12, %v130_v63  ;;  %v302_v63 = vld [vmem:[#allocation7 + $0x2] ss:$8 sm:$0x7] }
  0xe9   :  { %v307_v1 = vrot.slane %v302_v63, %v1679_v30  ;;  %v311_v2 = vrot.slane %v302_v63, %v1676_v29  ;;  %v315_v29 = vrot.slane %v302_v63, %v1710_v10  ;;  %v1145_v10 = vld [vmem:[#allocation7 + $0x4] ss:$0 sm:$0xff] }
  0xea   :  { %v182_v15 = vmul.f32 %v176_v11, %v163_v13 }
  0xec   :  { %v201_v16 = vadd.f32 %v195_v14, %v182_v15 }
  0xee   :  { %v204_v18 = vpack.c.bf16 %v201_v16, %v201_v16 }
  0xf0   :  { %777 = vmatmul.mubr.bf16.vlgmr.msra.gmra.mxu1 %v204_v18  ;;  %1335 = vmatmul.mubr.bf16.vlgmr.msra.gmra.mxu0 %v204_v18 }
  0xf1   :  { %1257 = vmatpush3.bf16.msra.mxu1 %v1452_v17  ;;  %817 = vmatprep.mubr.bf16.mxu1 %v1693_v44  ;;  %v1476_v44 = vld [vmem:[#allocation10 + $0x18] sm:$0xff]  }
  0xf2   :  { %1258 = vmatprep.subr.bf16.mxu1 %v1453_v19  ;;  %1354 = vmatprep.mubr.msk.bf16.mxu0 %vm1615_vm1, %v1612_v0 }
  0xf3   :  { %1339 = vmatpush3.bf16.msra.mxu0 %v1483_v51 }
  0xf4   :  { %1340 = vmatprep.subr.bf16.mxu0 %v1612_v0 }
  0xf5   :  { %1259 = vmatpush3.bf16.msra.mxu1 %v1454_v20 }
  0xf6   :  { %1260 = vmatprep.subr.bf16.mxu1 %v1455_v21 }
  0xf7   :  { %1341 = vmatpush3.bf16.msra.mxu0 %v1484_v52 }
  0xf8   :  { %1342 = vmatprep.subr.bf16.mxu0 %v1612_v0 }
  0xf9   :  { %1261 = vmatpush3.bf16.msra.mxu1 %v1456_v22 }
  0xfa   :  { %1262 = vmatprep.subr.bf16.mxu1 %v1457_v23 }
  0xfb   :  { %1343 = vmatpush3.bf16.msra.mxu0 %v1485_v53 }
  0xfc   :  { %1344 = vmatprep.subr.bf16.mxu0 %v1612_v0 }
  0xfd   :  { %1263 = vmatpush3.bf16.msra.mxu1 %v1458_v24 }
  0xfe   :  { %1264 = vmatprep.subr.bf16.mxu1 %v1459_v25 }
  0xff   :  { %1345 = vmatpush3.bf16.msra.mxu0 %v1486_v54 }
 0x100   :  { %1346 = vmatprep.subr.bf16.mxu0 %v1612_v0 }
 0x101   :  { %1265 = vmatpush3.bf16.msra.mxu1 %v1460_v26 }
 0x102   :  { %1266 = vmatprep.subr.bf16.mxu1 %v1461_v27 }
 0x103   :  { %1347 = vmatpush3.bf16.msra.mxu0 %v1487_v55 }
 0x104   :  { %1348 = vmatprep.subr.bf16.mxu0 %v1612_v0 }
 0x105   :  { %1267 = vmatpush3.bf16.msra.mxu1 %v1462_v28 }
 0x106   :  { %1268 = vmatprep.subr.bf16.mxu1 %v1463_v31 }
 0x107   :  { %1349 = vmatpush3.bf16.msra.mxu0 %v1488_v58 }
 0x108   :  { %1350 = vmatprep.subr.bf16.mxu0 %v1612_v0 }
 0x109   :  { %1269 = vmatpush3.bf16.msra.mxu1 %v1464_v32 }
 0x10a   :  { %1270 = vmatprep.subr.bf16.mxu1 %v1465_v33 }
 0x10b   :  { %1351 = vmatpush3.bf16.msra.mxu0 %v1489_v61 }
 0x10c   :  { %1352 = vmatprep.subr.bf16.mxu0 %v1612_v0 }
 0x10d   :  { %1271 = vmatpush3.bf16.msra.mxu1 %v1466_v34  ;;  %v919_v34 = vld [vmem:[#allocation7 + $0x3] ss:$0 sm:$0xff] }
 0x10e   :  { %1287 = vmatprep.subr.bf16.mxu1 %v1467_v35 }
 0x10f   :  { %1353 = vmatpush3.bf16.msra.mxu0 %v1490_v62 }
 0x110   :  { %818 = vmatmul.mubr.bf16.vlgmr.msra.gmra.mxu1 %v1695_v46  ;;  %v1479_v46 = vld [vmem:[#allocation10 + $0x48] sm:$0xff]  }
 0x111   :  { %1288 = vmatpush3.bf16.msra.mxu1 %v1468_v36 }
 0x112   :  { %1289 = vmatprep.subr.bf16.mxu1 %v1469_v37 }
 0x115   :  { %1290 = vmatpush3.bf16.msra.mxu1 %v1470_v38 }
 0x116   :  { %1291 = vmatprep.subr.bf16.mxu1 %v1471_v39 }
 0x119   :  { %1292 = vmatpush3.bf16.msra.mxu1 %v1472_v40 }
 0x11a   :  { %1293 = vmatprep.subr.bf16.mxu1 %v1473_v41 }
 0x11d   :  { %1294 = vmatpush3.bf16.msra.mxu1 %v1474_v42 }
 0x11e   :  { %1295 = vmatprep.subr.bf16.mxu1 %v1475_v43  ;;  %v1149_v43 = vld [vmem:[#allocation7 + $0x5] ss:$0 sm:$0xff] }
 0x121   :  { %1296 = vmatpush3.bf16.msra.mxu1 %v1476_v44 }
 0x122   :  { %1297 = vmatprep.subr.bf16.mxu1 %v1477_v45 }
 0x125   :  { %1298 = vmatpush3.bf16.msra.mxu1 %v1478_v47 }
 0x126   :  { %1299 = vmatprep.subr.bf16.mxu1 %v1479_v46 }
 0x129   :  { %1300 = vmatpush3.bf16.msra.mxu1 %v1480_v48 }
 0x12a   :  { %1301 = vmatprep.subr.bf16.mxu1 %v1481_v49 }
 0x12d   :  { %1302 = vmatpush3.bf16.msra.mxu1 %v1482_v50 }
 0x13e   :  { %v737_v56 = vpop.f32.mrf.mxu0 }
 0x13f   :  { %v738_v3 = vadd.f32 %v737_v56, %v307_v1 }
 0x140   :  { %v739_v57 = vpop.f32.mrf.mxu0 }
 0x141   :  { %v740_v4 = vadd.f32 %v739_v57, %v311_v2 }
 0x142   :  { %v741_v59 = vpop.f32.mrf.mxu0 }
 0x144   :  { %v742_v60 = vpop.f32.mrf.mxu0 }
 0x1b0   :  { %v778_v5 = vpop.f32.mrf.mxu1  ;;  %v859_v6 = vpop.f32.mrf.mxu0 }
 0x1b1   :  { %v779_v7 = vadd.f32 %v778_v5, %v738_v3 }
 0x1b2   :  { %v780_v8 = vpop.f32.mrf.mxu1  ;;  %v1336_v9 = vpop.f32.mrf.mxu0 }
 0x1b3   :  { %v781_v11 = vadd.f32 %v780_v8, %v740_v4  ;;  %v865_v12 = vmax.f32 %v779_v7, 0.0 }
 0x1b4   :  { %v782_v13 = vpop.f32.mrf.mxu1  ;;  %v862_v14 = vpop.f32.mrf.mxu0 }
 0x1b5   :  { %v866_v15 = vmax.f32 %v781_v11, 0.0  ;;  %v868_v18 = vpack.c.bf16 %v865_v12, %v865_v12 }
 0x1b6   :  { %v783_v0 = vpop.f32.mrf.mxu1  ;;  %v1337_v16 = vpop.f32.mrf.mxu0 }
 0x1b7   :  { %v869_v17 = vpack.c.bf16 %v866_v15, %v866_v15 }
 0x1b9   :  { %1096 = vmatprep.mubr.bf16.mxu1 %v869_v17 }
 0x1ba   :  { %1097 = vmatmul.mubr.bf16.vlgmr.msra.gmra.mxu1 %v868_v18 }
 0x1d0   :  { %v1272_v30 = vpop.f32.mrf.mxu1 }
 0x1d2   :  { %v1273_v19 = vpop.f32.mrf.mxu1 }
 0x1d3   :  { %v1274_v20 = vadd.f32 %v1273_v19, %v1272_v30 }
 0x1d4   :  { %v1275_v21 = vpop.f32.mrf.mxu1 }
 0x1d5   :  { %v820_v22 = vadd.f32 %v1274_v20, %v315_v29 }
 0x1d6   :  { %v1276_v23 = vpop.f32.mrf.mxu1 }
 0x1d7   :  { %v860_v24 = vadd.f32 %v859_v6, %v820_v22 }
 0x1d9   :  { %v867_v25 = vmax.f32 %v860_v24, 0.0 }
 0x1db   :  { %v870_v26 = vpack.c.bf16 %v867_v25, %v867_v25 }
 0x1dd   :  { %1355 = vmatmul.mubr.bf16.vlgmr.msra.gmra.mxu0 %v870_v26 }
 0x27a   :  { %v1303_v27 = vpop.f32.mrf.mxu1 }
 0x27c   :  { %v1304_v28 = vpop.f32.mrf.mxu1 }
 0x27d   :  { %v1305_v33 = vadd.f32 %v1304_v28, %v1303_v27 }
 0x27e   :  { %v1306_v31 = vpop.f32.mrf.mxu1 }
 0x27f   :  { %v1099_v35 = vadd.f32 %v1305_v33, %v919_v34 }
 0x280   :  { %v1307_v32 = vpop.f32.mrf.mxu1 }
 0x29d   :  { %v1138_v36 = vpop.f32.mrf.mxu0 }
 0x29e   :  { %v1139_v37 = vadd.f32 %v1138_v36, %v1099_v35 }
 0x29f   :  { %v1356_v38 = vpop.f32.mrf.mxu0 }
 0x2a0   :  { %v1144_v39 = vmax.f32 %v1139_v37, 0.0 }
 0x2a1   :  { %v1141_v40 = vpop.f32.mrf.mxu0 }
 0x2a2   :  { %v1146_v41 = vmul.f32 %v1145_v10, %v1144_v39 }
 0x2a3   :  { %v1357_v42 = vpop.f32.mrf.mxu0 }
 0x2a4   :  { %1147 = vadd.xlane.f32.xlu0 %v1146_v41 }
 0x32d   :  { %v1148_v44 = vpop.xlane.xlu0 %1147 }
 0x32e   :  { %v1150_v45 = vadd.f32 %v1149_v43, %v1148_v44 }
 0x330   :  { %1152 = vst.msk [vmem:[%s1738_s5] sm:$0xff] %vm1151_vm3, %v1150_v45 }
 0x331   :  { %1157 = vsyncpa [#allocation4], 1 }
 0x332   :  { %1158 = vsyncpa [#allocation6], 1 }
 0x333   :  { %1159 = vsyncpa [#allocation9], 1 }

</bundles_post_ra>
